<compile_context>
chip_gen: v7x
topology: tpu7x:2x2x1
jax: 0.10.0
libtpu: 0.0.40
codegen_flags: <defaults>
</compile_context>

<pallas_src>
import jax
import jax.numpy as jnp
from jax import lax
from jax.experimental import pallas as pl
from jax.experimental.pallas import tpu as pltpu


def _round_up(x, m):
    return ((x + m - 1) // m) * m


def _patch_embed_kernel(p_ref, w_ref, b_ref, o_ref):
    # p_ref: (tm, K_pad) bf16   w_ref: (K_pad, tn) bf16
    # b_ref: (1, tn)     f32    o_ref: (tm, tn)    f32
    acc = jnp.dot(p_ref[...], w_ref[...], preferred_element_type=jnp.float32)
    o_ref[...] = (acc + b_ref[...]).astype(o_ref.dtype)


def patch_embedding_pallas(x_nchw, weight_oihw, bias, patch_size):
    """Forward pass of PatchEmbedding.

    x_nchw:      (N, Cin, H, W)            float32 (PyTorch layout)
    weight_oihw: (num_hiddens, Cin, P, P)  float32 (PyTorch Conv2d weight layout)
    bias:        (num_hiddens,)            float32
    returns:     (N, num_patches, num_hiddens) float32
    """
    N, Cin, H, W = x_nchw.shape
    P = patch_size
    assert H % P == 0 and W % P == 0, "image size must be divisible by patch size"
    num_hiddens = weight_oihw.shape[0]
    Hp, Wp = H // P, W // P
    num_patches = Hp * Wp
    K = Cin * P * P
    M = N * num_patches

    # --- im2col: feature order (Cin, ph, pw) matches weight.reshape(H, Cin*P*P).
    # Wrapper-side layout plumbing; fine at ViT-sized inputs.
    # TODO(synk): for very high-res inputs, fold the patch gather into the pipeline
    # (BlockSpec over the NCHW input) instead of materializing `patches`.
    patches = x_nchw.reshape(N, Cin, Hp, P, Wp, P)
    patches = patches.transpose(0, 2, 4, 1, 3, 5).reshape(M, K)
    w_mat = weight_oihw.reshape(num_hiddens, K).T          # (K, num_hiddens)

    # Lane/sublane-aligned padding.
    K_pad = _round_up(K, 128)
    H_pad = _round_up(num_hiddens, 128)
    tm = 256 if M >= 256 else _round_up(M, 8)
    M_pad = _round_up(M, tm)

    # bf16 I/O, f32 accumulate. Zero padding is exact (contributes 0 to the dot).
    patches_p = jnp.zeros((M_pad, K_pad), jnp.bfloat16).at[:M, :K].set(
        patches.astype(jnp.bfloat16))
    w_p = jnp.zeros((K_pad, H_pad), jnp.bfloat16).at[:K, :num_hiddens].set(
        w_mat.astype(jnp.bfloat16))
    b_p = jnp.zeros((1, H_pad), jnp.float32).at[:, :num_hiddens].set(
        bias.reshape(1, num_hiddens).astype(jnp.float32))

    # Keep the whole weight resident in VMEM if small (ViT-B: ~1.2 MB in bf16);
    # otherwise tile hidden along the SLOW grid axis so the weight block index is
    # constant across the fast M axis (no redundant weight DMAs).
    if K_pad * H_pad * 2 <= 12 * 1024 * 1024:
        tn = H_pad
    elif H_pad % 512 == 0:
        tn = 512
    elif H_pad % 256 == 0:
        tn = 256
    else:
        tn = 128

    grid = (H_pad // tn, M_pad // tm)          # (slow: hidden tiles, fast: M tiles)

    out = pl.pallas_call(
        _patch_embed_kernel,
        out_shape=jax.ShapeDtypeStruct((M_pad, H_pad), jnp.float32),
        grid=grid,
        in_specs=[
            pl.BlockSpec((tm, K_pad), lambda j, i: (i, 0)),
            pl.BlockSpec((K_pad, tn), lambda j, i: (0, j)),  # constant on fast axis
            pl.BlockSpec((1, tn), lambda j, i: (0, j)),
        ],
        out_specs=pl.BlockSpec((tm, tn), lambda j, i: (i, j)),
        compiler_params=pltpu.CompilerParams(
            dimension_semantics=("parallel", "parallel")),
    )(patches_p, w_p, b_p)

    return out[:M, :num_hiddens].reshape(N, num_patches, num_hiddens)


# ----------------------------- pure-JAX reference -----------------------------
def patch_embedding_ref(x_nchw, weight_oihw, bias, patch_size):
    P = patch_size
    y = lax.conv_general_dilated(
        x_nchw, weight_oihw, window_strides=(P, P), padding="VALID",
        dimension_numbers=("NCHW", "OIHW", "NCHW"))
    y = y + bias.reshape(1, -1, 1, 1)
    n, c, hp, wp = y.shape
    return y.reshape(n, c, hp * wp).transpose(0, 2, 1)   # (N, num_patches, H)


if __name__ == "__main__":
    # Module defaults: img_size=96, patch_size=16, num_hiddens=512; RGB input.
    N, Cin, IMG, P, HID = 2, 3, 96, 16, 512

    key = jax.random.PRNGKey(0)
    kx, kw, kb = jax.random.split(key, 3)
    f32 = jnp.float32
    x = jax.random.normal(kx, (N, Cin, IMG, IMG), dtype=f32)            # NCHW
    w = (jax.random.normal(kw, (HID, Cin, P, P)) * 0.02).astype(f32)    # OIHW
    b = (jax.random.normal(kb, (HID,)) * 0.02).astype(f32)

    out = patch_embedding_pallas(x, w, b, P)
    out = jax.block_until_ready(out)

    ref = patch_embedding_ref(x, w, b, P)
    num_patches = (IMG // P) * (IMG // P)
    assert out.shape == (N, num_patches, HID), out.shape
    assert jnp.allclose(out, ref, atol=1e-2, rtol=1e-2), (
        "mismatch vs. reference, max abs diff = "
        f"{float(jnp.max(jnp.abs(out - ref)))}")

    print("KERNEL_OK")
</pallas_src>

<mosaic_0001>
module attributes {stable_mosaic.version = 11 : i64} {
  func.func @_patch_embed_kernel(%arg0: i32, %arg1: i32, %arg2: memref<72x768xbf16, #tpu.memory_space<vmem>>, %arg3: memref<768x512xbf16, #tpu.memory_space<vmem>>, %arg4: memref<1x512xf32, #tpu.memory_space<vmem>>, %arg5: memref<72x512xf32, #tpu.memory_space<vmem>>) attributes {dimension_semantics = [#tpu.dimension_semantics<parallel>, #tpu.dimension_semantics<parallel>], iteration_bounds = array<i64: 1, 1>, scalar_prefetch = 0 : i64, scratch_operands = 0 : i64, tpu.core_type = #tpu.core_type<tc>, window_params = [{transform_indices = @transform_0, window_bounds = array<i64: 72, 768>}, {transform_indices = @transform_1, window_bounds = array<i64: 768, 512>}, {transform_indices = @transform_2, window_bounds = array<i64: 1, 512>}, {transform_indices = @transform_3, window_bounds = array<i64: 72, 512>}]} {
    %c0 = arith.constant 0 : index
    %c0_0 = arith.constant 0 : index
    %0 = vector.load %arg2[%c0, %c0_0] : memref<72x768xbf16, #tpu.memory_space<vmem>>, vector<72x768xbf16>
    %c0_1 = arith.constant 0 : index
    %c0_2 = arith.constant 0 : index
    %1 = vector.load %arg3[%c0_1, %c0_2] : memref<768x512xbf16, #tpu.memory_space<vmem>>, vector<768x512xbf16>
    %cst = arith.constant dense<0.000000e+00> : vector<72x512xf32>
    %2 = tpu.matmul %0, %1, %cst {dimension_numbers = #tpu.dot_dimension_numbers<[1], [0], [0], [1], [0, 0, 1, 1], [], []>} : vector<72x768xbf16>, vector<768x512xbf16>, vector<72x512xf32> -> vector<72x512xf32>
    %c0_3 = arith.constant 0 : index
    %c0_4 = arith.constant 0 : index
    %3 = vector.load %arg4[%c0_3, %c0_4] : memref<1x512xf32, #tpu.memory_space<vmem>>, vector<1x512xf32>
    %4 = vector.broadcast %3 : vector<1x512xf32> to vector<72x512xf32>
    %5 = arith.addf %2, %4 : vector<72x512xf32>
    %c0_5 = arith.constant 0 : index
    %c0_6 = arith.constant 0 : index
    %6 = vector.load %arg5[%c0_5, %c0_6] : memref<72x512xf32, #tpu.memory_space<vmem>>, vector<72x512xf32>
    tpu.vector_store %arg5[%c0_5, %c0_6], %5 {strides = array<i32>} : memref<72x512xf32, #tpu.memory_space<vmem>>, vector<72x512xf32>,
    return
  }
  func.func @transform_0(%arg0: i32, %arg1: i32) -> (i32, i32) {
    %c0_i32 = arith.constant 0 : i32
    %c0_i32_0 = arith.constant 0 : i32
    return %arg1, %c0_i32 : i32, i32
  }
  func.func @transform_1(%arg0: i32, %arg1: i32) -> (i32, i32) {
    %c0_i32 = arith.constant 0 : i32
    %c0_i32_0 = arith.constant 0 : i32
    return %c0_i32, %arg0 : i32, i32
  }
  func.func @transform_2(%arg0: i32, %arg1: i32) -> (i32, i32) {
    %c0_i32 = arith.constant 0 : i32
    %c0_i32_0 = arith.constant 0 : i32
    return %c0_i32, %arg0 : i32, i32
  }
  func.func @transform_3(%arg0: i32, %arg1: i32) -> (i32, i32) {
    %c0_i32 = arith.constant 0 : i32
    return %arg1, %arg0 : i32, i32
  }
}

</mosaic_0001>

<bundles_post_ra>
// kernel: tpu_custom_call.1
= control target key start
LH: loop header
LB: loop body
LE: loop exit
PB: predicated region body
PF: predicated region fallthrough
CT: control target
= control target key end

     0   :  { %8 = vsyncpa [#allocation3], 0  ;;  %s2786_s0 = inlined_call_operand.hbm [shape: bf16[72,768], index: 0, kind: input, shape index: {}]   ;;  %s2787_s1 = inlined_call_operand.hbm [shape: bf16[768,512], index: 1, kind: input, shape index: {}]   ;;  %s2788_s2 = inlined_call_operand.vmem [shape: f32[1,512], index: 2, kind: input, shape index: {}]   ;;  %s2789_s3 = inlined_call_operand.hbm [shape: f32[72,512], index: 3, kind: output, shape index: {}]  }
   0x1   :  { %9 = vsyncpa [#allocation6], 0 }
   0x2   :  { %10 = vsyncpa [#allocation4], 0  ;;  %s2674_s12 = smov [#allocation2]   ;;  %s2602_s16 = scalar_lea.hbm %s2786_s0, 3456 }
   0x3   :  { %s16_s13 = sshll.u32 %s2674_s12, 4  ;;  %p2603_p0 = scmp.ne.s32.totalorder %s2786_s0, %s2602_s16  ;;  %s17_s13 = int_to_ptr.vmem [resolvable:$true] %s16_s13 }
   0x4   :  { %p2606_p1 = scmp.lt.u32.totalorder %s2602_s16, %s2786_s0 }
   0x6   :  { %p2608_p2 = pnand %p2606_p1, %p2603_p0 }
   0x8   :  { %2611 = shalt.err (!%p2608_p2)
}
   0x9   :  { %s2612_s21 = scalar_lea.vmem %s17_s13, 3456  ;;  %p2617_p4 = scmp.lt.s32.totalorder %s17_s13, %s17_s13 }
   0xa   :  { %p2613_p3 = scmp.ne.s32.totalorder %s17_s13, %s2612_s21  ;;  %p2618_p5 = scmp.lt.s32.totalorder %s2612_s21, %s2612_s21 }
   0xc   :  { %p2619_p6 = por %p2618_p5, %p2617_p4 }
   0xe   :  { %p2620_p7 = pnand %p2619_p6, %p2613_p3 }
  0x10   :  { %2623 = shalt.err (!%p2620_p7)
}
  0x11   :  { %s2675_s22 = smov 384   ;;  %s2676_s23 = smov 24  }
  0x12   :  { %22 = dma.hbm_to_vmem [thread:$0]  %s2786_s0, 3456, %s17_s13, [#allocation3], %s2675_s22, %s2675_s22, %s2676_s23  }
  0x13   :  { %s2677_s26 = smov [#allocation5]   ;;  %s2624_s30 = scalar_lea.hbm %s2787_s1, 24576 }
  0x14   :  { %s28_s27 = sshll.u32 %s2677_s26, 4  ;;  %p2625_p8 = scmp.ne.s32.totalorder %s2787_s1, %s2624_s30  ;;  %s29_s27 = int_to_ptr.vmem [resolvable:$true] %s28_s27 }
  0x15   :  { %p2628_p9 = scmp.lt.u32.totalorder %s2624_s30, %s2787_s1 }
  0x17   :  { %p2630_p10 = pnand %p2628_p9, %p2625_p8 }
  0x19   :  { %2633 = shalt.err (!%p2630_p10)
}
  0x1a   :  { %s2634_s8 = scalar_lea.vmem %s29_s27, 24576  ;;  %p2639_p12 = scmp.lt.s32.totalorder %s29_s27, %s29_s27 }
  0x1b   :  { %p2635_p11 = scmp.ne.s32.totalorder %s29_s27, %s2634_s8  ;;  %p2640_p13 = scmp.lt.s32.totalorder %s2634_s8, %s2634_s8 }
  0x1d   :  { %p2641_p0 = por %p2640_p13, %p2639_p12 }
  0x1f   :  { %p2642_p1 = pnand %p2641_p0, %p2635_p11 }
  0x21   :  { %2645 = shalt.err (!%p2642_p1)
}
  0x22   :  { %s2678_s0 = smov 256   ;;  %s2679_s9 = smov 16  }
  0x23   :  { %34 = dma.hbm_to_vmem [thread:$0]  %s2787_s1, 24576, %s29_s27, [#allocation6], %s2678_s0, %s2678_s0, %s2679_s9  }
  0x24   :  { %2668 = dma.done.wait [#allocation3], 3456  }
  0x25   :  { %2669 = vsyncadd [#allocation3], 4294963840 }
  0x26   :  { %2670 = dma.done.wait [#allocation6], 24576  }
  0x27   :  { %2671 = vsyncadd [#allocation6], 4294942720  ;;  %v2272_v0 = vld [vmem:[#allocation5 + $0x4] ss:$16 sps:$4 sm:$0xff]   ;;  %v2274_v1 = vld [vmem:[#allocation5 + $0xc] ss:$16 sps:$4 sm:$0xff]  }
  0x28   :  { %1385 = vmatprep.subr.bf16.mxu0 %v2272_v0  ;;  %v2276_v2 = vld [vmem:[#allocation5] ss:$16 sps:$4 sm:$0xff]   ;;  %v2277_v3 = vld [vmem:[#allocation5 + $0x8] ss:$16 sps:$4 sm:$0xff]   ;;  %1628 = vmatprep.subr.bf16.mxu1 %v2274_v1  ;;  %v2278_v4 = vld [vmem:[#allocation5 + $0x24] ss:$16 sps:$4 sm:$0xff]  }
  0x29   :  { %1386 = vmatpush1.bf16.msra.mxu0 %v2276_v2  ;;  %1629 = vmatpush1.bf16.msra.mxu1 %v2277_v3  ;;  %v2280_v5 = vld [vmem:[#allocation5 + $0x2c] ss:$16 sps:$4 sm:$0xff]   ;;  %v2282_v6 = vld [vmem:[#allocation5 + $0x20] ss:$16 sps:$4 sm:$0xff]   ;;  %v2283_v7 = vld [vmem:[#allocation5 + $0x28] ss:$16 sps:$4 sm:$0xff]  }
  0x2a   :  { %1387 = vmatprep.subr.bf16.mxu0 %v2278_v4  ;;  %1630 = vmatprep.subr.bf16.mxu1 %v2280_v5  ;;  %v2284_v8 = vld [vmem:[#allocation5 + $0x44] ss:$16 sps:$4 sm:$0xff]   ;;  %v2286_v9 = vld [vmem:[#allocation5 + $0x4c] ss:$16 sps:$4 sm:$0xff]   ;;  %v2288_v10 = vld [vmem:[#allocation5 + $0x40] ss:$16 sps:$4 sm:$0xff]  }
  0x2b   :  { %v2289_v11 = vld [vmem:[#allocation5 + $0x48] ss:$16 sps:$4 sm:$0xff]   ;;  %v2290_v12 = vld [vmem:[#allocation5 + $0x64] ss:$16 sps:$4 sm:$0xff]   ;;  %v2292_v13 = vld [vmem:[#allocation5 + $0x6c] ss:$16 sps:$4 sm:$0xff]  }
  0x2c   :  { %v2294_v14 = vld [vmem:[#allocation5 + $0x60] ss:$16 sps:$4 sm:$0xff]   ;;  %v2295_v15 = vld [vmem:[#allocation5 + $0x68] ss:$16 sps:$4 sm:$0xff]   ;;  %v2296_v16 = vld [vmem:[#allocation5 + $0x84] ss:$16 sps:$4 sm:$0xff]  }
  0x2d   :  { %1388 = vmatpush1.bf16.msra.mxu0 %v2282_v6  ;;  %1631 = vmatpush1.bf16.msra.mxu1 %v2283_v7  ;;  %v2298_v17 = vld [vmem:[#allocation5 + $0x8c] ss:$16 sps:$4 sm:$0xff]   ;;  %v2300_v18 = vld [vmem:[#allocation5 + $0x80] ss:$16 sps:$4 sm:$0xff]   ;;  %v2301_v19 = vld [vmem:[#allocation5 + $0x88] ss:$16 sps:$4 sm:$0xff]  }
  0x2e   :  { %1389 = vmatprep.subr.bf16.mxu0 %v2284_v8  ;;  %1632 = vmatprep.subr.bf16.mxu1 %v2286_v9  ;;  %v2302_v20 = vld [vmem:[#allocation5 + $0xa4] ss:$16 sps:$4 sm:$0xff]   ;;  %v2304_v21 = vld [vmem:[#allocation5 + $0xac] ss:$16 sps:$4 sm:$0xff]   ;;  %v2306_v22 = vld [vmem:[#allocation5 + $0xa0] ss:$16 sps:$4 sm:$0xff]  }
  0x2f   :  { %v2307_v23 = vld [vmem:[#allocation5 + $0xa8] ss:$16 sps:$4 sm:$0xff]   ;;  %v2308_v24 = vld [vmem:[#allocation5 + $0xc4] ss:$16 sps:$4 sm:$0xff]   ;;  %v2310_v25 = vld [vmem:[#allocation5 + $0xcc] ss:$16 sps:$4 sm:$0xff]  }
  0x30   :  { %v2312_v26 = vld [vmem:[#allocation5 + $0xc0] ss:$16 sps:$4 sm:$0xff]   ;;  %v2313_v27 = vld [vmem:[#allocation5 + $0xc8] ss:$16 sps:$4 sm:$0xff]   ;;  %v2314_v28 = vld [vmem:[#allocation5 + $0xe4] ss:$16 sps:$4 sm:$0xff]  }
  0x31   :  { %1390 = vmatpush1.bf16.msra.mxu0 %v2288_v10  ;;  %1633 = vmatpush1.bf16.msra.mxu1 %v2289_v11  ;;  %v2316_v29 = vld [vmem:[#allocation5 + $0xec] ss:$16 sps:$4 sm:$0xff]   ;;  %v2318_v30 = vld [vmem:[#allocation5 + $0xe0] ss:$16 sps:$4 sm:$0xff]   ;;  %v2319_v31 = vld [vmem:[#allocation5 + $0xe8] ss:$16 sps:$4 sm:$0xff]  }
  0x32   :  { %1391 = vmatprep.subr.bf16.mxu0 %v2290_v12  ;;  %1634 = vmatprep.subr.bf16.mxu1 %v2292_v13  ;;  %v2320_v32 = vld [vmem:[#allocation5 + $0x104] ss:$16 sps:$4 sm:$0xff]   ;;  %v2322_v33 = vld [vmem:[#allocation5 + $0x10c] ss:$16 sps:$4 sm:$0xff]   ;;  %v2324_v34 = vld [vmem:[#allocation5 + $0x100] ss:$16 sps:$4 sm:$0xff]  }
  0x33   :  { %v2325_v35 = vld [vmem:[#allocation5 + $0x108] ss:$16 sps:$4 sm:$0xff]   ;;  %v2326_v36 = vld [vmem:[#allocation5 + $0x124] ss:$16 sps:$4 sm:$0xff]   ;;  %v2328_v37 = vld [vmem:[#allocation5 + $0x12c] ss:$16 sps:$4 sm:$0xff]  }
  0x34   :  { %v2330_v38 = vld [vmem:[#allocation5 + $0x120] ss:$16 sps:$4 sm:$0xff]   ;;  %v2331_v39 = vld [vmem:[#allocation5 + $0x128] ss:$16 sps:$4 sm:$0xff]   ;;  %v2332_v40 = vld [vmem:[#allocation5 + $0x144] ss:$16 sps:$4 sm:$0xff]  }
  0x35   :  { %1392 = vmatpush1.bf16.msra.mxu0 %v2294_v14  ;;  %1635 = vmatpush1.bf16.msra.mxu1 %v2295_v15  ;;  %v2334_v41 = vld [vmem:[#allocation5 + $0x14c] ss:$16 sps:$4 sm:$0xff]   ;;  %v2336_v42 = vld [vmem:[#allocation5 + $0x140] ss:$16 sps:$4 sm:$0xff]   ;;  %v2337_v43 = vld [vmem:[#allocation5 + $0x148] ss:$16 sps:$4 sm:$0xff]  }
  0x36   :  { %1393 = vmatprep.subr.bf16.mxu0 %v2296_v16  ;;  %1636 = vmatprep.subr.bf16.mxu1 %v2298_v17  ;;  %v2338_v44 = vld [vmem:[#allocation5 + $0x164] ss:$16 sps:$4 sm:$0xff]   ;;  %v2340_v45 = vld [vmem:[#allocation5 + $0x16c] ss:$16 sps:$4 sm:$0xff]   ;;  %v2342_v46 = vld [vmem:[#allocation5 + $0x160] ss:$16 sps:$4 sm:$0xff]  }
  0x37   :  { %v2343_v47 = vld [vmem:[#allocation5 + $0x168] ss:$16 sps:$4 sm:$0xff]   ;;  %v2370_v48 = vld [vmem:[#allocation2 + $0x4] ss:$24 sps:$4 sm:$0xff]   ;;  %v2348_v51 = vld [vmem:[#allocation5 + $0x180] ss:$16 sps:$4 sm:$0xff]  }
  0x38   :  { %v2344_v49 = vld [vmem:[#allocation5 + $0x184] ss:$16 sps:$4 sm:$0xff]   ;;  %v2346_v50 = vld [vmem:[#allocation5 + $0x18c] ss:$16 sps:$4 sm:$0xff]   ;;  %1417 = vmatprep.mubr.bf16.mxu0 %v2370_v48  ;;  %1660 = vmatprep.mubr.bf16.mxu1 %v2370_v48  ;;  %v2349_v52 = vld [vmem:[#allocation5 + $0x188] ss:$16 sps:$4 sm:$0xff]  }
  0x39   :  { %1394 = vmatpush1.bf16.msra.mxu0 %v2300_v18  ;;  %1637 = vmatpush1.bf16.msra.mxu1 %v2301_v19  ;;  %v2350_v53 = vld [vmem:[#allocation5 + $0x1a4] ss:$16 sps:$4 sm:$0xff]   ;;  %v2352_v54 = vld [vmem:[#allocation5 + $0x1ac] ss:$16 sps:$4 sm:$0xff]   ;;  %v2354_v55 = vld [vmem:[#allocation5 + $0x1a0] ss:$16 sps:$4 sm:$0xff]  }
  0x3a   :  { %1395 = vmatprep.subr.bf16.mxu0 %v2302_v20  ;;  %1638 = vmatprep.subr.bf16.mxu1 %v2304_v21  ;;  %v2355_v56 = vld [vmem:[#allocation5 + $0x1a8] ss:$16 sps:$4 sm:$0xff]   ;;  %v2356_v57 = vld [vmem:[#allocation5 + $0x1c4] ss:$16 sps:$4 sm:$0xff]   ;;  %v2358_v58 = vld [vmem:[#allocation5 + $0x1cc] ss:$16 sps:$4 sm:$0xff]  }
  0x3b   :  { %v2360_v59 = vld [vmem:[#allocation5 + $0x1c0] ss:$16 sps:$4 sm:$0xff]   ;;  %v2361_v60 = vld [vmem:[#allocation5 + $0x1c8] ss:$16 sps:$4 sm:$0xff]   ;;  %v2362_v61 = vld [vmem:[#allocation5 + $0x1e4] ss:$16 sps:$4 sm:$0xff]  }
  0x3c   :  { %v2364_v62 = vld [vmem:[#allocation5 + $0x1ec] ss:$16 sps:$4 sm:$0xff]   ;;  %v2366_v63 = vld [vmem:[#allocation5 + $0x1e0] ss:$16 sps:$4 sm:$0xff]   ;;  %v2367_v0 = vld [vmem:[#allocation5 + $0x1e8] ss:$16 sps:$4 sm:$0xff]  }
  0x3d   :  { %1396 = vmatpush1.bf16.msra.mxu0 %v2306_v22  ;;  %1639 = vmatpush1.bf16.msra.mxu1 %v2307_v23  ;;  %v2373_v1 = vld [vmem:[#allocation5 + $0x204] ss:$16 sps:$4 sm:$0xff]   ;;  %v2376_v2 = vld [vmem:[#allocation5 + $0x20c] ss:$16 sps:$4 sm:$0xff]   ;;  %v2368_v3 = vld [vmem:[#allocation2] ss:$24 sps:$4 sm:$0xff]  }
  0x3e   :  { %1397 = vmatprep.subr.bf16.mxu0 %v2308_v24  ;;  %1640 = vmatprep.subr.bf16.mxu1 %v2310_v25  ;;  %v2371_v4 = vld [vmem:[#allocation5 + $0x200] ss:$16 sps:$4 sm:$0xff]   ;;  %v2374_v5 = vld [vmem:[#allocation5 + $0x208] ss:$16 sps:$4 sm:$0xff]   ;;  %v2379_v6 = vld [vmem:[#allocation5 + $0x224] ss:$16 sps:$4 sm:$0xff]  }
  0x3f   :  { %v2382_v7 = vld [vmem:[#allocation5 + $0x22c] ss:$16 sps:$4 sm:$0xff]   ;;  %v2377_v9 = vld [vmem:[#allocation5 + $0x220] ss:$16 sps:$4 sm:$0xff]   ;;  %v2380_v10 = vld [vmem:[#allocation5 + $0x228] ss:$16 sps:$4 sm:$0xff]  }
  0x40   :  { %v2419_v8 = vld [vmem:[#allocation2 + $0x34] ss:$24 sps:$4 sm:$0xff]   ;;  %v2383_v13 = vld [vmem:[#allocation5 + $0x240] ss:$16 sps:$4 sm:$0xff]   ;;  %v2386_v14 = vld [vmem:[#allocation5 + $0x248] ss:$16 sps:$4 sm:$0xff]  }
  0x41   :  { %1398 = vmatpush1.bf16.msra.mxu0 %v2312_v26  ;;  %1641 = vmatpush1.bf16.msra.mxu1 %v2313_v27  ;;  %v2385_v11 = vld [vmem:[#allocation5 + $0x244] ss:$16 sps:$4 sm:$0xff]   ;;  %v2388_v12 = vld [vmem:[#allocation5 + $0x24c] ss:$16 sps:$4 sm:$0xff]   ;;  %v2427_v15 = vld [vmem:[#allocation2 + $0x30] ss:$24 sps:$4 sm:$0xff]  }
  0x42   :  { %1399 = vmatprep.subr.bf16.mxu0 %v2314_v28  ;;  %1642 = vmatprep.subr.bf16.mxu1 %v2316_v29  ;;  %v2391_v16 = vld [vmem:[#allocation5 + $0x264] ss:$16 sps:$4 sm:$0xff]   ;;  %v2394_v17 = vld [vmem:[#allocation5 + $0x26c] ss:$16 sps:$4 sm:$0xff]   ;;  %v2389_v19 = vld [vmem:[#allocation5 + $0x260] ss:$16 sps:$4 sm:$0xff]  }
  0x43   :  { %v2434_v18 = vld [vmem:[#allocation2 + $0x64] ss:$24 sps:$4 sm:$0xff]   ;;  %v2392_v20 = vld [vmem:[#allocation5 + $0x268] ss:$16 sps:$4 sm:$0xff]   ;;  %v2395_v23 = vld [vmem:[#allocation5 + $0x280] ss:$16 sps:$4 sm:$0xff]  }
  0x44   :  { %v2397_v21 = vld [vmem:[#allocation5 + $0x284] ss:$16 sps:$4 sm:$0xff]   ;;  %v2400_v22 = vld [vmem:[#allocation5 + $0x28c] ss:$16 sps:$4 sm:$0xff]   ;;  %v2442_v24 = vld [vmem:[#allocation2 + $0x60] ss:$24 sps:$4 sm:$0xff]  }
  0x45   :  { %1400 = vmatpush1.bf16.msra.mxu0 %v2318_v30  ;;  %1643 = vmatpush1.bf16.msra.mxu1 %v2319_v31  ;;  %v2398_v25 = vld [vmem:[#allocation5 + $0x288] ss:$16 sps:$4 sm:$0xff]   ;;  %v2403_v26 = vld [vmem:[#allocation5 + $0x2a4] ss:$16 sps:$4 sm:$0xff]   ;;  %v2406_v27 = vld [vmem:[#allocation5 + $0x2ac] ss:$16 sps:$4 sm:$0xff]  }
  0x46   :  { %1401 = vmatprep.subr.bf16.mxu0 %v2320_v32  ;;  %1644 = vmatprep.subr.bf16.mxu1 %v2322_v33  ;;  %v2449_v28 = vld [vmem:[#allocation2 + $0x94] ss:$24 sps:$4 sm:$0xff]   ;;  %v2401_v29 = vld [vmem:[#allocation5 + $0x2a0] ss:$16 sps:$4 sm:$0xff]   ;;  %v2404_v30 = vld [vmem:[#allocation5 + $0x2a8] ss:$16 sps:$4 sm:$0xff]  }
  0x47   :  { %v2409_v31 = vld [vmem:[#allocation5 + $0x2c4] ss:$16 sps:$4 sm:$0xff]   ;;  %v2412_v32 = vld [vmem:[#allocation5 + $0x2cc] ss:$16 sps:$4 sm:$0xff]   ;;  %v2407_v33 = vld [vmem:[#allocation5 + $0x2c0] ss:$16 sps:$4 sm:$0xff]  }
  0x48   :  { %v2433_v48 = vld [vmem:[#allocation5 + $0x32c] ss:$16 sps:$4 sm:$0xff]  }
  0x49   :  { %1402 = vmatpush1.bf16.msra.mxu0 %v2324_v34  ;;  %1645 = vmatpush1.bf16.msra.mxu1 %v2325_v35  ;;  %v2457_v34 = vld [vmem:[#allocation2 + $0x90] ss:$24 sps:$4 sm:$0xff]   ;;  %v67_v35 = vld [vmem:[#allocation2 + $0xc0] sm:$0xff] }
  0x4a   :  { %1403 = vmatprep.subr.bf16.mxu0 %v2326_v36  ;;  %1646 = vmatprep.subr.bf16.mxu1 %v2328_v37  ;;  %v2410_v36 = vld [vmem:[#allocation5 + $0x2c8] ss:$16 sps:$4 sm:$0xff]   ;;  %v2415_v37 = vld [vmem:[#allocation5 + $0x2e4] ss:$16 sps:$4 sm:$0xff]  }
  0x4d   :  { %1404 = vmatpush1.bf16.msra.mxu0 %v2330_v38  ;;  %1647 = vmatpush1.bf16.msra.mxu1 %v2331_v39  ;;  %v2418_v38 = vld [vmem:[#allocation5 + $0x2ec] ss:$16 sps:$4 sm:$0xff]   ;;  %v1950_v39 = vcombine.high %v67_v35, %v67_v35 }
  0x4e   :  { %1405 = vmatprep.subr.bf16.mxu0 %v2332_v40  ;;  %1648 = vmatprep.subr.bf16.mxu1 %v2334_v41  ;;  %v2413_v40 = vld [vmem:[#allocation5 + $0x2e0] ss:$16 sps:$4 sm:$0xff]   ;;  %v2416_v41 = vld [vmem:[#allocation5 + $0x2e8] ss:$16 sps:$4 sm:$0xff]  }
  0x51   :  { %1406 = vmatpush1.bf16.msra.mxu0 %v2336_v42  ;;  %1649 = vmatpush1.bf16.msra.mxu1 %v2337_v43  ;;  %v2423_v42 = vld [vmem:[#allocation5 + $0x304] ss:$16 sps:$4 sm:$0xff]   ;;  %v2426_v43 = vld [vmem:[#allocation5 + $0x30c] ss:$16 sps:$4 sm:$0xff]  }
  0x52   :  { %1407 = vmatprep.subr.bf16.mxu0 %v2338_v44  ;;  %1650 = vmatprep.subr.bf16.mxu1 %v2340_v45  ;;  %v2421_v44 = vld [vmem:[#allocation5 + $0x300] ss:$16 sps:$4 sm:$0xff]   ;;  %v1949_v45 = vcombine.low %v67_v35, %v67_v35 }
  0x53   :  { %v2505_v35 = vld [vmem:[#allocation5 + $0x480] ss:$16 sps:$4 sm:$0xff]  }
  0x55   :  { %1408 = vmatpush1.bf16.msra.mxu0 %v2342_v46  ;;  %1651 = vmatpush1.bf16.msra.mxu1 %v2343_v47  ;;  %v2424_v46 = vld [vmem:[#allocation5 + $0x308] ss:$16 sps:$4 sm:$0xff]   ;;  %v2430_v47 = vld [vmem:[#allocation5 + $0x324] ss:$16 sps:$4 sm:$0xff]  }
  0x56   :  { %1409 = vmatprep.subr.bf16.mxu0 %v2344_v49  ;;  %1652 = vmatprep.subr.bf16.mxu1 %v2346_v50  ;;  %v2480_v49 = vld [vmem:[#allocation2 + $0xc] ss:$24 sps:$4 sm:$0xff]   ;;  %v2428_v50 = vld [vmem:[#allocation5 + $0x320] ss:$16 sps:$4 sm:$0xff]  }
  0x59   :  { %1410 = vmatpush1.bf16.msra.mxu0 %v2348_v51  ;;  %1653 = vmatpush1.bf16.msra.mxu1 %v2349_v52  ;;  %v2431_v51 = vld [vmem:[#allocation5 + $0x328] ss:$16 sps:$4 sm:$0xff]   ;;  %v2438_v52 = vld [vmem:[#allocation5 + $0x344] ss:$16 sps:$4 sm:$0xff]  }
  0x5a   :  { %1411 = vmatprep.subr.bf16.mxu0 %v2350_v53  ;;  %1654 = vmatprep.subr.bf16.mxu1 %v2352_v54  ;;  %v2441_v53 = vld [vmem:[#allocation5 + $0x34c] ss:$16 sps:$4 sm:$0xff]   ;;  %v2436_v54 = vld [vmem:[#allocation5 + $0x340] ss:$16 sps:$4 sm:$0xff]  }
  0x5d   :  { %1412 = vmatpush1.bf16.msra.mxu0 %v2354_v55  ;;  %1655 = vmatpush1.bf16.msra.mxu1 %v2355_v56  ;;  %v2439_v55 = vld [vmem:[#allocation5 + $0x348] ss:$16 sps:$4 sm:$0xff]   ;;  %v2445_v56 = vld [vmem:[#allocation5 + $0x364] ss:$16 sps:$4 sm:$0xff]  }
  0x5e   :  { %1413 = vmatprep.subr.bf16.mxu0 %v2356_v57  ;;  %1656 = vmatprep.subr.bf16.mxu1 %v2358_v58  ;;  %v2448_v57 = vld [vmem:[#allocation5 + $0x36c] ss:$16 sps:$4 sm:$0xff]   ;;  %v2443_v58 = vld [vmem:[#allocation5 + $0x360] ss:$16 sps:$4 sm:$0xff]  }
  0x61   :  { %1414 = vmatpush1.bf16.msra.mxu0 %v2360_v59  ;;  %1657 = vmatpush1.bf16.msra.mxu1 %v2361_v60  ;;  %v2446_v59 = vld [vmem:[#allocation5 + $0x368] ss:$16 sps:$4 sm:$0xff]   ;;  %v2453_v60 = vld [vmem:[#allocation5 + $0x384] ss:$16 sps:$4 sm:$0xff]  }
  0x62   :  { %1415 = vmatprep.subr.bf16.mxu0 %v2362_v61  ;;  %1658 = vmatprep.subr.bf16.mxu1 %v2364_v62  ;;  %v2456_v61 = vld [vmem:[#allocation5 + $0x38c] ss:$16 sps:$4 sm:$0xff]   ;;  %v2451_v62 = vld [vmem:[#allocation5 + $0x380] ss:$16 sps:$4 sm:$0xff]  }
  0x65   :  { %1416 = vmatpush1.bf16.msra.mxu0 %v2366_v63  ;;  %1659 = vmatpush1.bf16.msra.mxu1 %v2367_v0  ;;  %v2454_v63 = vld [vmem:[#allocation5 + $0x388] ss:$16 sps:$4 sm:$0xff]   ;;  %v2460_v0 = vld [vmem:[#allocation5 + $0x3a4] ss:$16 sps:$4 sm:$0xff]  }
  0x66   :  { %1466 = vmatprep.subr.bf16.mxu0 %v2373_v1  ;;  %1709 = vmatprep.subr.bf16.mxu1 %v2376_v2  ;;  %v2463_v1 = vld [vmem:[#allocation5 + $0x3ac] ss:$16 sps:$4 sm:$0xff]   ;;  %v2458_v2 = vld [vmem:[#allocation5 + $0x3a0] ss:$16 sps:$4 sm:$0xff]  }
  0x68   :  { %1418 = vmatmul.mubr.bf16.vlgmr.msra.gmra.mrb[0].mxu0 %v2368_v3  ;;  %1661 = vmatmul.mubr.bf16.vlgmr.msra.gmra.mrb[0].mxu1 %v2368_v3  ;;  %v2461_v3 = vld [vmem:[#allocation5 + $0x3a8] ss:$16 sps:$4 sm:$0xff]  }
  0x69   :  { %1467 = vmatpush1.bf16.msra.mxu0 %v2371_v4  ;;  %1710 = vmatpush1.bf16.msra.mxu1 %v2374_v5  ;;  %v2467_v4 = vld [vmem:[#allocation5 + $0x3c4] ss:$16 sps:$4 sm:$0xff]   ;;  %v2470_v5 = vld [vmem:[#allocation5 + $0x3cc] ss:$16 sps:$4 sm:$0xff]  }
  0x6a   :  { %1468 = vmatprep.subr.bf16.mxu0 %v2379_v6  ;;  %1711 = vmatprep.subr.bf16.mxu1 %v2382_v7  ;;  %v2465_v6 = vld [vmem:[#allocation5 + $0x3c0] ss:$16 sps:$4 sm:$0xff]   ;;  %v2468_v7 = vld [vmem:[#allocation5 + $0x3c8] ss:$16 sps:$4 sm:$0xff]  }
  0x6b   :  { %1427 = vmatprep.mubr.bf16.mxu0 %v2419_v8  ;;  %1670 = vmatprep.mubr.bf16.mxu1 %v2419_v8  ;;  %v2474_v8 = vld [vmem:[#allocation5 + $0x3e4] ss:$16 sps:$4 sm:$0xff]  }
  0x6d   :  { %1469 = vmatpush1.bf16.msra.mxu0 %v2377_v9  ;;  %1712 = vmatpush1.bf16.msra.mxu1 %v2380_v10  ;;  %v2477_v9 = vld [vmem:[#allocation5 + $0x3ec] ss:$16 sps:$4 sm:$0xff]   ;;  %v2472_v10 = vld [vmem:[#allocation5 + $0x3e0] ss:$16 sps:$4 sm:$0xff]  }
  0x6e   :  { %1470 = vmatprep.subr.bf16.mxu0 %v2385_v11  ;;  %1713 = vmatprep.subr.bf16.mxu1 %v2388_v12  ;;  %v2475_v11 = vld [vmem:[#allocation5 + $0x3e8] ss:$16 sps:$4 sm:$0xff]   ;;  %v2483_v12 = vld [vmem:[#allocation5 + $0x404] ss:$16 sps:$4 sm:$0xff]  }
  0x70   :  { %1428 = vmatmul.mubr.bf16.gmra.mrb[4].mxu0 %v2427_v15  ;;  %1671 = vmatmul.mubr.bf16.gmra.mrb[4].mxu1 %v2427_v15  ;;  %v2481_v15 = vld [vmem:[#allocation5 + $0x400] ss:$16 sps:$4 sm:$0xff]  }
  0x71   :  { %1471 = vmatpush1.bf16.msra.mxu0 %v2383_v13  ;;  %1714 = vmatpush1.bf16.msra.mxu1 %v2386_v14  ;;  %v2486_v13 = vld [vmem:[#allocation5 + $0x40c] ss:$16 sps:$4 sm:$0xff]   ;;  %v2478_v14 = vld [vmem:[#allocation2 + $0x8] ss:$24 sps:$4 sm:$0xff]  }
  0x72   :  { %1472 = vmatprep.subr.bf16.mxu0 %v2391_v16  ;;  %1715 = vmatprep.subr.bf16.mxu1 %v2394_v17  ;;  %v2484_v16 = vld [vmem:[#allocation5 + $0x408] ss:$16 sps:$4 sm:$0xff]   ;;  %v2489_v17 = vld [vmem:[#allocation5 + $0x424] ss:$16 sps:$4 sm:$0xff]  }
  0x73   :  { %1437 = vmatprep.mubr.bf16.mxu0 %v2434_v18  ;;  %1680 = vmatprep.mubr.bf16.mxu1 %v2434_v18  ;;  %v2492_v18 = vld [vmem:[#allocation5 + $0x42c] ss:$16 sps:$4 sm:$0xff]  }
  0x75   :  { %1473 = vmatpush1.bf16.msra.mxu0 %v2389_v19  ;;  %1716 = vmatpush1.bf16.msra.mxu1 %v2392_v20  ;;  %v2529_v19 = vld [vmem:[#allocation2 + $0x3c] ss:$24 sps:$4 sm:$0xff]   ;;  %v2487_v20 = vld [vmem:[#allocation5 + $0x420] ss:$16 sps:$4 sm:$0xff]  }
  0x76   :  { %1474 = vmatprep.subr.bf16.mxu0 %v2397_v21  ;;  %1717 = vmatprep.subr.bf16.mxu1 %v2400_v22  ;;  %v2490_v21 = vld [vmem:[#allocation5 + $0x428] ss:$16 sps:$4 sm:$0xff]   ;;  %v2495_v22 = vld [vmem:[#allocation5 + $0x444] ss:$16 sps:$4 sm:$0xff]  }
  0x78   :  { %1438 = vmatmul.mubr.bf16.gmra.mrb[8].mxu0 %v2442_v24  ;;  %1681 = vmatmul.mubr.bf16.gmra.mrb[8].mxu1 %v2442_v24  ;;  %v2531_v24 = vld [vmem:[#allocation2 + $0x38] ss:$24 sps:$4 sm:$0xff]  }
  0x79   :  { %1475 = vmatpush1.bf16.msra.mxu0 %v2395_v23  ;;  %1718 = vmatpush1.bf16.msra.mxu1 %v2398_v25  ;;  %v2498_v23 = vld [vmem:[#allocation5 + $0x44c] ss:$16 sps:$4 sm:$0xff]   ;;  %v2493_v25 = vld [vmem:[#allocation5 + $0x440] ss:$16 sps:$4 sm:$0xff]  }
  0x7a   :  { %1476 = vmatprep.subr.bf16.mxu0 %v2403_v26  ;;  %1719 = vmatprep.subr.bf16.mxu1 %v2406_v27  ;;  %v2496_v26 = vld [vmem:[#allocation5 + $0x448] ss:$16 sps:$4 sm:$0xff]   ;;  %v2501_v27 = vld [vmem:[#allocation5 + $0x464] ss:$16 sps:$4 sm:$0xff]  }
  0x7b   :  { %1447 = vmatprep.mubr.bf16.mxu0 %v2449_v28  ;;  %1690 = vmatprep.mubr.bf16.mxu1 %v2449_v28  ;;  %v2504_v28 = vld [vmem:[#allocation5 + $0x46c] ss:$16 sps:$4 sm:$0xff]  }
  0x7d   :  { %1477 = vmatpush1.bf16.msra.mxu0 %v2401_v29  ;;  %1720 = vmatpush1.bf16.msra.mxu1 %v2404_v30  ;;  %v2544_v29 = vld [vmem:[#allocation2 + $0x6c] ss:$24 sps:$4 sm:$0xff]   ;;  %v2499_v30 = vld [vmem:[#allocation5 + $0x460] ss:$16 sps:$4 sm:$0xff]  }
  0x7e   :  { %1478 = vmatprep.subr.bf16.mxu0 %v2409_v31  ;;  %1721 = vmatprep.subr.bf16.mxu1 %v2412_v32  ;;  %v2502_v31 = vld [vmem:[#allocation5 + $0x468] ss:$16 sps:$4 sm:$0xff]   ;;  %v2507_v32 = vld [vmem:[#allocation5 + $0x484] ss:$16 sps:$4 sm:$0xff]  }
  0x80   :  { %1448 = vmatmul.mubr.bf16.gmra.mrb[12].mxu0 %v2457_v34  ;;  %1691 = vmatmul.mubr.bf16.gmra.mrb[12].mxu1 %v2457_v34  ;;  %v2546_v34 = vld [vmem:[#allocation2 + $0x68] ss:$24 sps:$4 sm:$0xff]  }
  0x81   :  { %1479 = vmatpush1.bf16.msra.mxu0 %v2407_v33  ;;  %1722 = vmatpush1.bf16.msra.mxu1 %v2410_v36  ;;  %v2510_v33 = vld [vmem:[#allocation5 + $0x48c] ss:$16 sps:$4 sm:$0xff]   ;;  %v2508_v36 = vld [vmem:[#allocation5 + $0x488] ss:$16 sps:$4 sm:$0xff]  }
  0x82   :  { %1480 = vmatprep.subr.bf16.mxu0 %v2415_v37  ;;  %1723 = vmatprep.subr.bf16.mxu1 %v2418_v38  ;;  %v2513_v37 = vld [vmem:[#allocation5 + $0x4a4] ss:$16 sps:$4 sm:$0xff]   ;;  %v2516_v38 = vld [vmem:[#allocation5 + $0x4ac] ss:$16 sps:$4 sm:$0xff]  }
  0x83   :  { %1457 = vmatprep.mubr.bf16.mxu0 %v1950_v39  ;;  %1700 = vmatprep.mubr.bf16.mxu1 %v1950_v39  ;;  %v2559_v39 = vld [vmem:[#allocation2 + $0x9c] ss:$24 sps:$4 sm:$0xff]  }
  0x85   :  { %1481 = vmatpush1.bf16.msra.mxu0 %v2413_v40  ;;  %1724 = vmatpush1.bf16.msra.mxu1 %v2416_v41  ;;  %v2511_v40 = vld [vmem:[#allocation5 + $0x4a0] ss:$16 sps:$4 sm:$0xff]   ;;  %v2514_v41 = vld [vmem:[#allocation5 + $0x4a8] ss:$16 sps:$4 sm:$0xff]  }
  0x86   :  { %1482 = vmatprep.subr.bf16.mxu0 %v2423_v42  ;;  %1725 = vmatprep.subr.bf16.mxu1 %v2426_v43  ;;  %v2519_v42 = vld [vmem:[#allocation5 + $0x4c4] ss:$16 sps:$4 sm:$0xff]   ;;  %v2522_v43 = vld [vmem:[#allocation5 + $0x4cc] ss:$16 sps:$4 sm:$0xff]  }
  0x88   :  { %1458 = vmatmul.mubr.bf16.gmra.mrb[16].mxu0 %v1949_v45  ;;  %1701 = vmatmul.mubr.bf16.gmra.mrb[16].mxu1 %v1949_v45  ;;  %v68_v45 = vld [vmem:[#allocation2 + $0xc8] sm:$0xff] }
  0x89   :  { %1483 = vmatpush1.bf16.msra.mxu0 %v2421_v44  ;;  %1726 = vmatpush1.bf16.msra.mxu1 %v2424_v46  ;;  %v2561_v44 = vld [vmem:[#allocation2 + $0x98] ss:$24 sps:$4 sm:$0xff]  }
  0x8a   :  { %1484 = vmatprep.subr.bf16.mxu0 %v2430_v47  ;;  %1727 = vmatprep.subr.bf16.mxu1 %v2433_v48  ;;  %v2517_v46 = vld [vmem:[#allocation5 + $0x4c0] ss:$16 sps:$4 sm:$0xff]   ;;  %v2520_v47 = vld [vmem:[#allocation5 + $0x4c8] ss:$16 sps:$4 sm:$0xff]   ;;  %v2525_v48 = vld [vmem:[#allocation5 + $0x4e4] ss:$16 sps:$4 sm:$0xff]  }
  0x8b   :  { %1498 = vmatprep.mubr.bf16.mxu0 %v2480_v49  ;;  %1741 = vmatprep.mubr.bf16.mxu1 %v2480_v49  ;;  %v2528_v49 = vld [vmem:[#allocation5 + $0x4ec] ss:$16 sps:$4 sm:$0xff]  }
  0x8d   :  { %1485 = vmatpush1.bf16.msra.mxu0 %v2428_v50  ;;  %1728 = vmatpush1.bf16.msra.mxu1 %v2431_v51  ;;  %v1952_v50 = vcombine.high %v68_v45, %v68_v45  ;;  %v2523_v51 = vld [vmem:[#allocation5 + $0x4e0] ss:$16 sps:$4 sm:$0xff]  }
  0x8e   :  { %1486 = vmatprep.subr.bf16.mxu0 %v2438_v52  ;;  %1729 = vmatprep.subr.bf16.mxu1 %v2441_v53  ;;  %v2526_v52 = vld [vmem:[#allocation5 + $0x4e8] ss:$16 sps:$4 sm:$0xff]   ;;  %v2534_v53 = vld [vmem:[#allocation5 + $0x504] ss:$16 sps:$4 sm:$0xff]  }
  0x91   :  { %1487 = vmatpush1.bf16.msra.mxu0 %v2436_v54  ;;  %1730 = vmatpush1.bf16.msra.mxu1 %v2439_v55  ;;  %v2537_v54 = vld [vmem:[#allocation5 + $0x50c] ss:$16 sps:$4 sm:$0xff]   ;;  %v1951_v55 = vcombine.low %v68_v45, %v68_v45 }
  0x92   :  { %1488 = vmatprep.subr.bf16.mxu0 %v2445_v56  ;;  %1731 = vmatprep.subr.bf16.mxu1 %v2448_v57  ;;  %v2532_v56 = vld [vmem:[#allocation5 + $0x500] ss:$16 sps:$4 sm:$0xff]   ;;  %v2535_v57 = vld [vmem:[#allocation5 + $0x508] ss:$16 sps:$4 sm:$0xff]  }
  0x95   :  { %1489 = vmatpush1.bf16.msra.mxu0 %v2443_v58  ;;  %1732 = vmatpush1.bf16.msra.mxu1 %v2446_v59  ;;  %v2540_v58 = vld [vmem:[#allocation5 + $0x524] ss:$16 sps:$4 sm:$0xff]   ;;  %v2543_v59 = vld [vmem:[#allocation5 + $0x52c] ss:$16 sps:$4 sm:$0xff]  }
  0x96   :  { %1490 = vmatprep.subr.bf16.mxu0 %v2453_v60  ;;  %1733 = vmatprep.subr.bf16.mxu1 %v2456_v61  ;;  %v2590_v60 = vld [vmem:[#allocation2 + $0x14] ss:$24 sps:$4 sm:$0xff]   ;;  %v2538_v61 = vld [vmem:[#allocation5 + $0x520] ss:$16 sps:$4 sm:$0xff]  }
  0x99   :  { %1491 = vmatpush1.bf16.msra.mxu0 %v2451_v62  ;;  %1734 = vmatpush1.bf16.msra.mxu1 %v2454_v63  ;;  %v2541_v62 = vld [vmem:[#allocation5 + $0x528] ss:$16 sps:$4 sm:$0xff]   ;;  %v2549_v63 = vld [vmem:[#allocation5 + $0x544] ss:$16 sps:$4 sm:$0xff]  }
  0x9a   :  { %1492 = vmatprep.subr.bf16.mxu0 %v2460_v0  ;;  %1735 = vmatprep.subr.bf16.mxu1 %v2463_v1  ;;  %v2552_v0 = vld [vmem:[#allocation5 + $0x54c] ss:$16 sps:$4 sm:$0xff]   ;;  %v2547_v1 = vld [vmem:[#allocation5 + $0x540] ss:$16 sps:$4 sm:$0xff]  }
  0x9d   :  { %1493 = vmatpush1.bf16.msra.mxu0 %v2458_v2  ;;  %1736 = vmatpush1.bf16.msra.mxu1 %v2461_v3  ;;  %v2550_v2 = vld [vmem:[#allocation5 + $0x548] ss:$16 sps:$4 sm:$0xff]   ;;  %v2555_v3 = vld [vmem:[#allocation5 + $0x564] ss:$16 sps:$4 sm:$0xff]  }
  0x9e   :  { %1494 = vmatprep.subr.bf16.mxu0 %v2467_v4  ;;  %1737 = vmatprep.subr.bf16.mxu1 %v2470_v5  ;;  %v2558_v4 = vld [vmem:[#allocation5 + $0x56c] ss:$16 sps:$4 sm:$0xff]   ;;  %v2553_v5 = vld [vmem:[#allocation5 + $0x560] ss:$16 sps:$4 sm:$0xff]  }
  0xa1   :  { %1495 = vmatpush1.bf16.msra.mxu0 %v2465_v6  ;;  %1738 = vmatpush1.bf16.msra.mxu1 %v2468_v7  ;;  %v2556_v6 = vld [vmem:[#allocation5 + $0x568] ss:$16 sps:$4 sm:$0xff]   ;;  %v2564_v7 = vld [vmem:[#allocation5 + $0x584] ss:$16 sps:$4 sm:$0xff]  }
  0xa2   :  { %1496 = vmatprep.subr.bf16.mxu0 %v2474_v8  ;;  %1739 = vmatprep.subr.bf16.mxu1 %v2477_v9  ;;  %v2567_v8 = vld [vmem:[#allocation5 + $0x58c] ss:$16 sps:$4 sm:$0xff]   ;;  %v2562_v9 = vld [vmem:[#allocation5 + $0x580] ss:$16 sps:$4 sm:$0xff]  }
  0xa5   :  { %1497 = vmatpush1.bf16.msra.mxu0 %v2472_v10  ;;  %1740 = vmatpush1.bf16.msra.mxu1 %v2475_v11  ;;  %v2565_v10 = vld [vmem:[#allocation5 + $0x588] ss:$16 sps:$4 sm:$0xff]   ;;  %v2570_v11 = vld [vmem:[#allocation5 + $0x5a4] ss:$16 sps:$4 sm:$0xff]  }
  0xa6   :  { %1547 = vmatprep.subr.bf16.mxu0 %v2483_v12  ;;  %1790 = vmatprep.subr.bf16.mxu1 %v2486_v13  ;;  %v2573_v12 = vld [vmem:[#allocation5 + $0x5ac] ss:$16 sps:$4 sm:$0xff]   ;;  %v2568_v13 = vld [vmem:[#allocation5 + $0x5a0] ss:$16 sps:$4 sm:$0xff]  }
  0xa8   :  { %1499 = vmatmul.mubr.bf16.vlgmr.msra.gmra.mrb[0].mxu0 %v2478_v14  ;;  %1742 = vmatmul.mubr.bf16.vlgmr.msra.gmra.mrb[0].mxu1 %v2478_v14  ;;  %v2571_v14 = vld [vmem:[#allocation5 + $0x5a8] ss:$16 sps:$4 sm:$0xff]  }
  0xa9   :  { %1548 = vmatpush1.bf16.msra.mxu0 %v2481_v15  ;;  %1791 = vmatpush1.bf16.msra.mxu1 %v2484_v16  ;;  %v2578_v15 = vld [vmem:[#allocation5 + $0x5c4] ss:$16 sps:$4 sm:$0xff]   ;;  %v2581_v16 = vld [vmem:[#allocation5 + $0x5cc] ss:$16 sps:$4 sm:$0xff]  }
  0xaa   :  { %1549 = vmatprep.subr.bf16.mxu0 %v2489_v17  ;;  %1792 = vmatprep.subr.bf16.mxu1 %v2492_v18  ;;  %v2576_v17 = vld [vmem:[#allocation5 + $0x5c0] ss:$16 sps:$4 sm:$0xff]   ;;  %v2579_v18 = vld [vmem:[#allocation5 + $0x5c8] ss:$16 sps:$4 sm:$0xff]  }
  0xab   :  { %1508 = vmatprep.mubr.bf16.mxu0 %v2529_v19  ;;  %1751 = vmatprep.mubr.bf16.mxu1 %v2529_v19  ;;  %v2584_v19 = vld [vmem:[#allocation5 + $0x5e4] ss:$16 sps:$4 sm:$0xff]  }
  0xad   :  { %1550 = vmatpush1.bf16.msra.mxu0 %v2487_v20  ;;  %1793 = vmatpush1.bf16.msra.mxu1 %v2490_v21  ;;  %v2587_v20 = vld [vmem:[#allocation5 + $0x5ec] ss:$16 sps:$4 sm:$0xff]   ;;  %v2582_v21 = vld [vmem:[#allocation5 + $0x5e0] ss:$16 sps:$4 sm:$0xff]  }
  0xae   :  { %1551 = vmatprep.subr.bf16.mxu0 %v2495_v22  ;;  %1794 = vmatprep.subr.bf16.mxu1 %v2498_v23  ;;  %v2585_v22 = vld [vmem:[#allocation5 + $0x5e8] ss:$16 sps:$4 sm:$0xff]  }
  0xaf   :  { %v2588_v23 = vld [vmem:[#allocation2 + $0x10] ss:$24 sps:$4 sm:$0xff]  }
  0xb0   :  { %1509 = vmatmul.mubr.bf16.gmra.mrb[4].mxu0 %v2531_v24  ;;  %1752 = vmatmul.mubr.bf16.gmra.mrb[4].mxu1 %v2531_v24  ;;  %v2591_v24 = vld [vmem:[#allocation2 + $0x44] ss:$24 sps:$4 sm:$0xff]  }
  0xb1   :  { %1552 = vmatpush1.bf16.msra.mxu0 %v2493_v25  ;;  %1795 = vmatpush1.bf16.msra.mxu1 %v2496_v26  ;;  %v2593_v25 = vld [vmem:[#allocation2 + $0x40] ss:$24 sps:$4 sm:$0xff]   ;;  %v2594_v26 = vld [vmem:[#allocation2 + $0x74] ss:$24 sps:$4 sm:$0xff]  }
  0xb2   :  { %1553 = vmatprep.subr.bf16.mxu0 %v2501_v27  ;;  %1796 = vmatprep.subr.bf16.mxu1 %v2504_v28  ;;  %v2596_v27 = vld [vmem:[#allocation2 + $0x70] ss:$24 sps:$4 sm:$0xff]   ;;  %v2597_v28 = vld [vmem:[#allocation2 + $0xa4] ss:$24 sps:$4 sm:$0xff]  }
  0xb3   :  { %1518 = vmatprep.mubr.bf16.mxu0 %v2544_v29  ;;  %1761 = vmatprep.mubr.bf16.mxu1 %v2544_v29  ;;  %v69_v29 = vld [vmem:[#allocation2 + $0xd0] sm:$0xff] }
  0xb5   :  { %1554 = vmatpush1.bf16.msra.mxu0 %v2499_v30  ;;  %1797 = vmatpush1.bf16.msra.mxu1 %v2502_v31  ;;  %v2599_v30 = vld [vmem:[#allocation2 + $0xa0] ss:$24 sps:$4 sm:$0xff]   ;;  %v1954_v31 = vcombine.high %v69_v29, %v69_v29 }
  0xb6   :  { %1555 = vmatprep.subr.bf16.mxu0 %v2507_v32  ;;  %1798 = vmatprep.subr.bf16.mxu1 %v2510_v33  ;;  %v1953_v32 = vcombine.low %v69_v29, %v69_v29  ;;  %v264_v33 = vlaneseq }
  0xb8   :  { %1519 = vmatmul.mubr.bf16.gmra.mrb[8].mxu0 %v2546_v34  ;;  %1762 = vmatmul.mubr.bf16.gmra.mrb[8].mxu1 %v2546_v34  ;;  %v265_v34 = vshrl.u32 %v264_v33, 7 }
  0xb9   :  { %1556 = vmatpush1.bf16.msra.mxu0 %v2505_v35  ;;  %1799 = vmatpush1.bf16.msra.mxu1 %v2508_v36 }
  0xba   :  { %1557 = vmatprep.subr.bf16.mxu0 %v2513_v37  ;;  %1800 = vmatprep.subr.bf16.mxu1 %v2516_v38  ;;  %v266_v35 = vsub.s32 0, %v265_v34  ;;  %v274_v36 = vsub.s32 2, %v265_v34  ;;  %v262_v37 = vld [vmem:[%s2788_s2] sm:$0xf]  ;;  %v270_v38 = vsub.s32 1, %v265_v34  ;;  %s2680_s2 = smov [#allocation7]  }
  0xbb   :  { %1528 = vmatprep.mubr.bf16.mxu0 %v2559_v39  ;;  %1771 = vmatprep.mubr.bf16.mxu1 %v2559_v39  ;;  %v278_v39 = vsub.s32 3, %v265_v34  ;;  %s1912_s13 = sshll.u32 %s2680_s2, 4  ;;  %s1913_s13 = int_to_ptr.vmem [resolvable:$true] %s1912_s13 }
  0xbc   :  { %s2646_s14 = scalar_lea.vmem %s1913_s13, 4608  ;;  %p2651_p3 = scmp.lt.s32.totalorder %s1913_s13, %s1913_s13 }
  0xbd   :  { %1558 = vmatpush1.bf16.msra.mxu0 %v2511_v40  ;;  %1801 = vmatpush1.bf16.msra.mxu1 %v2514_v41  ;;  %v2730_v40 = vrot.slane %v262_v37, %v266_v35  ;;  %v2732_v41 = vrot.slane %v262_v37, %v274_v36  ;;  %p2647_p2 = scmp.ne.s32.totalorder %s1913_s13, %s2646_s14  ;;  %p2652_p4 = scmp.lt.s32.totalorder %s2646_s14, %s2646_s14 }
  0xbe   :  { %1559 = vmatprep.subr.bf16.mxu0 %v2519_v42  ;;  %1802 = vmatprep.subr.bf16.mxu1 %v2522_v43  ;;  %v2734_v42 = vrot.slane %v262_v37, %v270_v38  ;;  %v2736_v43 = vrot.slane %v262_v37, %v278_v39 }
  0xbf   :  { %p2653_p5 = por %p2652_p4, %p2651_p3 }
  0xc0   :  { %1529 = vmatmul.mubr.bf16.gmra.mrb[12].mxu0 %v2561_v44  ;;  %1772 = vmatmul.mubr.bf16.gmra.mrb[12].mxu1 %v2561_v44 }
  0xc1   :  { %1560 = vmatpush1.bf16.msra.mxu0 %v2517_v46  ;;  %1803 = vmatpush1.bf16.msra.mxu1 %v2520_v47  ;;  %p2654_p6 = pnand %p2653_p5, %p2647_p2 }
  0xc2   :  { %1561 = vmatprep.subr.bf16.mxu0 %v2525_v48  ;;  %1804 = vmatprep.subr.bf16.mxu1 %v2528_v49 }
  0xc3   :  { %1538 = vmatprep.mubr.bf16.mxu0 %v1952_v50  ;;  %1781 = vmatprep.mubr.bf16.mxu1 %v1952_v50 }
  0xc5   :  { %1562 = vmatpush1.bf16.msra.mxu0 %v2523_v51  ;;  %1805 = vmatpush1.bf16.msra.mxu1 %v2526_v52 }
  0xc6   :  { %1563 = vmatprep.subr.bf16.mxu0 %v2534_v53  ;;  %1806 = vmatprep.subr.bf16.mxu1 %v2537_v54 }
  0xc8   :  { %1539 = vmatmul.mubr.bf16.gmra.mrb[16].mxu0 %v1951_v55  ;;  %1782 = vmatmul.mubr.bf16.gmra.mrb[16].mxu1 %v1951_v55 }
  0xc9   :  { %1564 = vmatpush1.bf16.msra.mxu0 %v2532_v56  ;;  %1807 = vmatpush1.bf16.msra.mxu1 %v2535_v57 }
  0xca   :  { %1565 = vmatprep.subr.bf16.mxu0 %v2540_v58  ;;  %1808 = vmatprep.subr.bf16.mxu1 %v2543_v59 }
  0xcb   :  { %1579 = vmatprep.mubr.bf16.mxu0 %v2590_v60  ;;  %1822 = vmatprep.mubr.bf16.mxu1 %v2590_v60 }
  0xcd   :  { %1566 = vmatpush1.bf16.msra.mxu0 %v2538_v61  ;;  %1809 = vmatpush1.bf16.msra.mxu1 %v2541_v62 }
  0xce   :  { %1567 = vmatprep.subr.bf16.mxu0 %v2549_v63  ;;  %1810 = vmatprep.subr.bf16.mxu1 %v2552_v0 }
  0xd1   :  { %1568 = vmatpush1.bf16.msra.mxu0 %v2547_v1  ;;  %1811 = vmatpush1.bf16.msra.mxu1 %v2550_v2 }
  0xd2   :  { %1569 = vmatprep.subr.bf16.mxu0 %v2555_v3  ;;  %1812 = vmatprep.subr.bf16.mxu1 %v2558_v4 }
  0xd5   :  { %1570 = vmatpush1.bf16.msra.mxu0 %v2553_v5  ;;  %1813 = vmatpush1.bf16.msra.mxu1 %v2556_v6 }
  0xd6   :  { %1571 = vmatprep.subr.bf16.mxu0 %v2564_v7  ;;  %1814 = vmatprep.subr.bf16.mxu1 %v2567_v8 }
  0xd9   :  { %1572 = vmatpush1.bf16.msra.mxu0 %v2562_v9  ;;  %1815 = vmatpush1.bf16.msra.mxu1 %v2565_v10 }
  0xda   :  { %1573 = vmatprep.subr.bf16.mxu0 %v2570_v11  ;;  %1816 = vmatprep.subr.bf16.mxu1 %v2573_v12 }
  0xdd   :  { %1574 = vmatpush1.bf16.msra.mxu0 %v2568_v13  ;;  %1817 = vmatpush1.bf16.msra.mxu1 %v2571_v14 }
  0xde   :  { %1575 = vmatprep.subr.bf16.mxu0 %v2578_v15  ;;  %1818 = vmatprep.subr.bf16.mxu1 %v2581_v16 }
  0xe1   :  { %1576 = vmatpush1.bf16.msra.mxu0 %v2576_v17  ;;  %1819 = vmatpush1.bf16.msra.mxu1 %v2579_v18 }
  0xe2   :  { %1577 = vmatprep.subr.bf16.mxu0 %v2584_v19  ;;  %1820 = vmatprep.subr.bf16.mxu1 %v2587_v20 }
  0xe5   :  { %1578 = vmatpush1.bf16.msra.mxu0 %v2582_v21  ;;  %1821 = vmatpush1.bf16.msra.mxu1 %v2585_v22 }
  0xe8   :  { %1580 = vmatmul.mubr.bf16.vlgmr.msra.gmra.mrb[0].mxu0 %v2588_v23  ;;  %1823 = vmatmul.mubr.bf16.vlgmr.msra.gmra.mrb[0].mxu1 %v2588_v23 }
  0xe9   :  { %1589 = vmatprep.mubr.bf16.mxu0 %v2591_v24  ;;  %1832 = vmatprep.mubr.bf16.mxu1 %v2591_v24 }
  0xf0   :  { %1590 = vmatmul.mubr.bf16.gmra.mrb[4].mxu0 %v2593_v25  ;;  %1833 = vmatmul.mubr.bf16.gmra.mrb[4].mxu1 %v2593_v25 }
  0xf1   :  { %1599 = vmatprep.mubr.bf16.mxu0 %v2594_v26  ;;  %1842 = vmatprep.mubr.bf16.mxu1 %v2594_v26 }
  0xf8   :  { %1600 = vmatmul.mubr.bf16.gmra.mrb[8].mxu0 %v2596_v27  ;;  %1843 = vmatmul.mubr.bf16.gmra.mrb[8].mxu1 %v2596_v27 }
  0xf9   :  { %1609 = vmatprep.mubr.bf16.mxu0 %v2597_v28  ;;  %1852 = vmatprep.mubr.bf16.mxu1 %v2597_v28 }
 0x100   :  { %1610 = vmatmul.mubr.bf16.gmra.mrb[12].mxu0 %v2599_v30  ;;  %1853 = vmatmul.mubr.bf16.gmra.mrb[12].mxu1 %v2599_v30 }
 0x101   :  { %1619 = vmatprep.mubr.bf16.mxu0 %v1954_v31  ;;  %1862 = vmatprep.mubr.bf16.mxu1 %v1954_v31 }
 0x108   :  { %1620 = vmatmul.mubr.bf16.gmra.mrb[16].mxu0 %v1953_v32  ;;  %1863 = vmatmul.mubr.bf16.gmra.mrb[16].mxu1 %v1953_v32 }
 0x1bb   :  { %v1581_v44 = vpop.f32.mrb[0].mxu0  ;;  %v1824_v45 = vpop.f32.mrb[0].mxu1 }
 0x1bc   :  { %v2147_v46 = vadd.f32 %v1581_v44, %v2730_v40  ;;  %v2165_v47 = vadd.f32 %v1824_v45, %v2732_v41  ;;  %v1583_v48 = vpop.f32.mrb[1].mxu0  ;;  %v1826_v49 = vpop.f32.mrb[1].mxu1 }
 0x1bd   :  { %v2148_v50 = vadd.f32 %v1583_v48, %v2734_v42  ;;  %v2166_v51 = vadd.f32 %v1826_v49, %v2736_v43  ;;  %v1585_v52 = vpop.f32.mrb[2].mxu0  ;;  %v1828_v53 = vpop.f32.mrb[2].mxu1 }
 0x1be   :  { %1871 = vst [vmem:[#allocation7] sm:$0xff] %v2147_v46  ;;  %1873 = vst [vmem:[#allocation7 + $0x10] sm:$0xff] %v2165_v47  ;;  %v2149_v54 = vadd.f32 %v1585_v52, %v2730_v40  ;;  %v2167_v55 = vadd.f32 %v1828_v53, %v2732_v41  ;;  %v1587_v56 = vpop.f32.mrb[3].mxu0  ;;  %v1830_v57 = vpop.f32.mrb[3].mxu1 }
 0x1bf   :  { %1872 = vst [vmem:[#allocation7 + $0x8] sm:$0xff] %v2148_v50  ;;  %1874 = vst [vmem:[#allocation7 + $0x18] sm:$0xff] %v2166_v51  ;;  %v2150_v58 = vadd.f32 %v1587_v56, %v2734_v42  ;;  %v2168_v59 = vadd.f32 %v1830_v57, %v2736_v43 }
 0x1c0   :  { %1875 = vst [vmem:[#allocation7 + $0x20] sm:$0xff] %v2149_v54  ;;  %1877 = vst [vmem:[#allocation7 + $0x30] sm:$0xff] %v2167_v55 }
 0x1c1   :  { %1876 = vst [vmem:[#allocation7 + $0x28] sm:$0xff] %v2150_v58  ;;  %1878 = vst [vmem:[#allocation7 + $0x38] sm:$0xff] %v2168_v59 }
 0x1c3   :  { %v1591_v60 = vpop.f32.mrb[4].mxu0  ;;  %v1834_v61 = vpop.f32.mrb[4].mxu1 }
 0x1c4   :  { %v2151_v62 = vadd.f32 %v1591_v60, %v2730_v40  ;;  %v2169_v63 = vadd.f32 %v1834_v61, %v2732_v41  ;;  %v1593_v0 = vpop.f32.mrb[5].mxu0  ;;  %v1836_v1 = vpop.f32.mrb[5].mxu1 }
 0x1c5   :  { %v2152_v2 = vadd.f32 %v1593_v0, %v2734_v42  ;;  %v2170_v3 = vadd.f32 %v1836_v1, %v2736_v43  ;;  %v1595_v4 = vpop.f32.mrb[6].mxu0  ;;  %v1838_v5 = vpop.f32.mrb[6].mxu1 }
 0x1c6   :  { %1879 = vst [vmem:[#allocation7 + $0x40] sm:$0xff] %v2151_v62  ;;  %1881 = vst [vmem:[#allocation7 + $0x50] sm:$0xff] %v2169_v63  ;;  %v2153_v6 = vadd.f32 %v1595_v4, %v2730_v40  ;;  %v2171_v7 = vadd.f32 %v1838_v5, %v2732_v41  ;;  %v1597_v8 = vpop.f32.mrb[7].mxu0  ;;  %v1840_v9 = vpop.f32.mrb[7].mxu1 }
 0x1c7   :  { %1880 = vst [vmem:[#allocation7 + $0x48] sm:$0xff] %v2152_v2  ;;  %1882 = vst [vmem:[#allocation7 + $0x58] sm:$0xff] %v2170_v3  ;;  %v2154_v10 = vadd.f32 %v1597_v8, %v2734_v42  ;;  %v2172_v11 = vadd.f32 %v1840_v9, %v2736_v43 }
 0x1c8   :  { %1883 = vst [vmem:[#allocation7 + $0x60] sm:$0xff] %v2153_v6  ;;  %1885 = vst [vmem:[#allocation7 + $0x70] sm:$0xff] %v2171_v7 }
 0x1c9   :  { %1884 = vst [vmem:[#allocation7 + $0x68] sm:$0xff] %v2154_v10  ;;  %1886 = vst [vmem:[#allocation7 + $0x78] sm:$0xff] %v2172_v11 }
 0x1cb   :  { %v1601_v12 = vpop.f32.mrb[8].mxu0  ;;  %v1844_v13 = vpop.f32.mrb[8].mxu1 }
 0x1cc   :  { %v2155_v14 = vadd.f32 %v1601_v12, %v2730_v40  ;;  %v2173_v15 = vadd.f32 %v1844_v13, %v2732_v41  ;;  %v1603_v16 = vpop.f32.mrb[9].mxu0  ;;  %v1846_v17 = vpop.f32.mrb[9].mxu1 }
 0x1cd   :  { %v2156_v18 = vadd.f32 %v1603_v16, %v2734_v42  ;;  %v2174_v19 = vadd.f32 %v1846_v17, %v2736_v43  ;;  %v1605_v20 = vpop.f32.mrb[10].mxu0  ;;  %v1848_v21 = vpop.f32.mrb[10].mxu1 }
 0x1ce   :  { %1887 = vst [vmem:[#allocation7 + $0x80] sm:$0xff] %v2155_v14  ;;  %1889 = vst [vmem:[#allocation7 + $0x90] sm:$0xff] %v2173_v15  ;;  %v2157_v22 = vadd.f32 %v1605_v20, %v2730_v40  ;;  %v2175_v23 = vadd.f32 %v1848_v21, %v2732_v41  ;;  %v1607_v24 = vpop.f32.mrb[11].mxu0  ;;  %v1850_v25 = vpop.f32.mrb[11].mxu1 }
 0x1cf   :  { %1888 = vst [vmem:[#allocation7 + $0x88] sm:$0xff] %v2156_v18  ;;  %1890 = vst [vmem:[#allocation7 + $0x98] sm:$0xff] %v2174_v19  ;;  %v2158_v26 = vadd.f32 %v1607_v24, %v2734_v42  ;;  %v2176_v27 = vadd.f32 %v1850_v25, %v2736_v43 }
 0x1d0   :  { %1891 = vst [vmem:[#allocation7 + $0xa0] sm:$0xff] %v2157_v22  ;;  %1893 = vst [vmem:[#allocation7 + $0xb0] sm:$0xff] %v2175_v23 }
 0x1d1   :  { %1892 = vst [vmem:[#allocation7 + $0xa8] sm:$0xff] %v2158_v26  ;;  %1894 = vst [vmem:[#allocation7 + $0xb8] sm:$0xff] %v2176_v27 }
 0x1d3   :  { %v1611_v28 = vpop.f32.mrb[12].mxu0  ;;  %v1854_v29 = vpop.f32.mrb[12].mxu1 }
 0x1d4   :  { %v2159_v30 = vadd.f32 %v1611_v28, %v2730_v40  ;;  %v2177_v31 = vadd.f32 %v1854_v29, %v2732_v41  ;;  %v1613_v32 = vpop.f32.mrb[13].mxu0  ;;  %v1856_v33 = vpop.f32.mrb[13].mxu1 }
 0x1d5   :  { %v2160_v34 = vadd.f32 %v1613_v32, %v2734_v42  ;;  %v2178_v35 = vadd.f32 %v1856_v33, %v2736_v43  ;;  %v1615_v36 = vpop.f32.mrb[14].mxu0  ;;  %v1858_v37 = vpop.f32.mrb[14].mxu1 }
 0x1d6   :  { %1895 = vst [vmem:[#allocation7 + $0xc0] sm:$0xff] %v2159_v30  ;;  %1897 = vst [vmem:[#allocation7 + $0xd0] sm:$0xff] %v2177_v31  ;;  %v2161_v38 = vadd.f32 %v1615_v36, %v2730_v40  ;;  %v2179_v39 = vadd.f32 %v1858_v37, %v2732_v41  ;;  %v1617_v44 = vpop.f32.mrb[15].mxu0  ;;  %v1860_v45 = vpop.f32.mrb[15].mxu1 }
 0x1d7   :  { %1896 = vst [vmem:[#allocation7 + $0xc8] sm:$0xff] %v2160_v34  ;;  %1898 = vst [vmem:[#allocation7 + $0xd8] sm:$0xff] %v2178_v35  ;;  %v2162_v46 = vadd.f32 %v1617_v44, %v2734_v42  ;;  %v2180_v47 = vadd.f32 %v1860_v45, %v2736_v43 }
 0x1d8   :  { %1899 = vst [vmem:[#allocation7 + $0xe0] sm:$0xff] %v2161_v38  ;;  %1901 = vst [vmem:[#allocation7 + $0xf0] sm:$0xff] %v2179_v39 }
 0x1d9   :  { %1900 = vst [vmem:[#allocation7 + $0xe8] sm:$0xff] %v2162_v46  ;;  %1902 = vst [vmem:[#allocation7 + $0xf8] sm:$0xff] %v2180_v47 }
 0x1db   :  { %v1621_v48 = vpop.f32.mrb[16].mxu0  ;;  %v1864_v49 = vpop.f32.mrb[16].mxu1 }
 0x1dc   :  { %v2163_v50 = vadd.f32 %v1621_v48, %v2730_v40  ;;  %v2181_v51 = vadd.f32 %v1864_v49, %v2732_v41  ;;  %v1623_v52 = vpop.f32.mrb[17].mxu0  ;;  %v1866_v53 = vpop.f32.mrb[17].mxu1 }
 0x1dd   :  { %v2164_v54 = vadd.f32 %v1623_v52, %v2734_v42  ;;  %v2182_v55 = vadd.f32 %v1866_v53, %v2736_v43  ;;  %v1625_v56 = vpop.f32.mrb[18].mxu0  ;;  %v1868_v57 = vpop.f32.mrb[18].mxu1 }
 0x1de   :  { %1903 = vst [vmem:[#allocation7 + $0x100] sm:$0xff] %v2163_v50  ;;  %1905 = vst [vmem:[#allocation7 + $0x110] sm:$0xff] %v2181_v51  ;;  %v1626_v58 = vpop.f32.mrb[19].mxu0  ;;  %v1869_v59 = vpop.f32.mrb[19].mxu1 }
 0x1df   :  { %1904 = vst [vmem:[#allocation7 + $0x108] sm:$0xff] %v2164_v54  ;;  %1906 = vst [vmem:[#allocation7 + $0x118] sm:$0xff] %v2182_v55 }
 0x1e0   :  { %2657 = shalt.err (!%p2654_p6)
}
 0x1e1   :  { %s2658_s17 = scalar_lea.hbm %s2789_s3, 4608 }
 0x1e2   :  { %p2659_p7 = scmp.ne.s32.totalorder %s2789_s3, %s2658_s17  ;;  %p2662_p8 = scmp.lt.u32.totalorder %s2658_s17, %s2789_s3 }
 0x1e4   :  { %p2664_p9 = pnand %p2662_p8, %p2659_p7 }
 0x1e6   :  { %2667 = shalt.err (!%p2664_p9)
}
 0x1e7   :  { %s2681_s22 = smov 512   ;;  %s2682_s23 = smov 32  }
 0x1e8   :  { %1918 = dma.vmem_to_hbm [thread:$0]  %s1913_s13, 4608, %s2789_s3, [#allocation4], %s2681_s22, %s2681_s22, %s2682_s23  }
 0x1e9   :  { %2672 = dma.done.wait [#allocation4], 4608  }
 0x1ea   :  { %2673 = vsyncadd [#allocation4], 4294962688 }
 0x1eb   :  { %1922 = vsyncpa [#allocation3], 1 }
 0x1ec   :  { %1923 = vsyncpa [#allocation6], 1 }
 0x1ed   :  { %1924 = vsyncpa [#allocation4], 1 }

</bundles_post_ra>
